<compile_context>
chip_gen: v7x
topology: tpu7x:2x2x1
jax: 0.10.0
libtpu: 0.0.40
codegen_flags: <defaults>
</compile_context>

<pallas_src>
import functools

import jax
import jax.numpy as jnp
from jax.experimental import pallas as pl
from jax.experimental.pallas import tpu as pltpu


def _round_up(n, m):
    return ((n + m - 1) // m) * m


def _fused_bidir_cell(inp, w, b):
    """One bidirectional LSTM step (seq_len==1, zero initial state), directions fused.

    inp: (B, Din) f32
    w:   (Din, 6H) gate-major packed columns [i_f i_b | g_f g_b | o_f o_b]
         (forget-gate columns already stripped: c0 == 0 makes them dead)
    b:   (1, 6H)   folded bias (b_ih + b_hh), same packing
    returns h = [h_fwd | h_bwd]  of shape (B, 2H)
    """
    gates = jnp.dot(inp, w, preferred_element_type=jnp.float32) + b
    h2 = gates.shape[-1] // 3                      # == 2 * hidden
    i = jax.nn.sigmoid(gates[:, 0:h2])
    g = jnp.tanh(gates[:, h2:2 * h2])
    o = jax.nn.sigmoid(gates[:, 2 * h2:3 * h2])
    return o * jnp.tanh(i * g)                     # c = f*c0 + i*g = i*g


def bilstm_kernel(x_ref, w0_ref, b0_ref, w1_ref, b1_ref, wfc_ref, bfc_ref, out_ref):
    x = x_ref[...]

    # Layer 0 (Din -> 2H), both directions in one MXU matmul.
    h1 = _fused_bidir_cell(x, w0_ref[...], b0_ref[...])
    # TODO(synk): training-mode dropout (p=0.5) between LSTM layers omitted (inference).
    # Layer 1 (2H -> 2H), both directions in one MXU matmul.
    h2 = _fused_bidir_cell(h1, w1_ref[...], b1_ref[...])     # == lstm_out[:, -1, :]

    # Final Linear(2H -> 1) + Sigmoid: VPU broadcast-mul + XLU lane reduce
    # instead of an N=1 MXU matmul (avoids MXU push/pop latency on the tail).
    logits = jnp.sum(h2 * wfc_ref[...], axis=-1, keepdims=True) + bfc_ref[...]
    out_ref[...] = jax.nn.sigmoid(logits)


@functools.partial(jax.jit, static_argnames=("block_b",))
def bilstm_forward(x, packed, block_b=None):
    w0, b0, w1, b1, wfc, bfc = packed
    B, Din = x.shape
    H6 = w0.shape[1]            # 6 * hidden
    H2 = H6 // 3                # 2 * hidden

    # Pad batch to a sublane-aligned block; one grid step per block, "parallel" axis.
    if block_b is None:
        block_b = min(256, _round_up(B, 8))
    pB = _round_up(B, block_b)
    if pB != B:
        x = jnp.pad(x, ((0, pB - B), (0, 0)))

    grid = (pB // block_b,)
    out = pl.pallas_call(
        bilstm_kernel,
        out_shape=jax.ShapeDtypeStruct((pB, 1), jnp.float32),
        grid=grid,
        in_specs=[
            pl.BlockSpec((block_b, Din), lambda i: (i, 0)),   # x: tiled over batch
            pl.BlockSpec((Din, H6), lambda i: (0, 0)),        # layer-0 fused weights (resident)
            pl.BlockSpec((1, H6), lambda i: (0, 0)),          # layer-0 fused bias
            pl.BlockSpec((H2, H6), lambda i: (0, 0)),         # layer-1 fused weights (resident)
            pl.BlockSpec((1, H6), lambda i: (0, 0)),          # layer-1 fused bias
            pl.BlockSpec((1, H2), lambda i: (0, 0)),          # fc weight row
            pl.BlockSpec((1, 1), lambda i: (0, 0)),           # fc bias
        ],
        out_specs=pl.BlockSpec((block_b, 1), lambda i: (i, 0)),
        compiler_params=pltpu.CompilerParams(
            dimension_semantics=("parallel",)),
    )(x, w0, b0, w1, b1, wfc, bfc)
    return out[:B]


def init_params(key, input_size, hidden_size, output_size=1):
    """PyTorch-style uniform init, raw (unfused) per-direction LSTM weights."""
    H = hidden_size
    k_lstm = 1.0 / jnp.sqrt(H)
    k_fc = 1.0 / jnp.sqrt(2 * H)
    keys = jax.random.split(key, 14)

    def u(k, shape, s):
        return jax.random.uniform(k, shape, jnp.float32, -s, s)

    def lstm_dir(ks, in_dim):
        w_ih = u(ks[0], (4 * H, in_dim), k_lstm)   # gate rows [i, f, g, o] (PyTorch order)
        b_ih = u(ks[1], (4 * H,), k_lstm)
        b_hh = u(ks[2], (4 * H,), k_lstm)
        # weight_hh never contributes (h0 == 0 for seq_len == 1) -> not generated.
        return w_ih, b_ih, b_hh

    raw = {
        "l0f": lstm_dir(keys[0:3], input_size),
        "l0b": lstm_dir(keys[3:6], input_size),
        "l1f": lstm_dir(keys[6:9], 2 * H),
        "l1b": lstm_dir(keys[9:12], 2 * H),
        "fc": (u(keys[12], (output_size, 2 * H), k_fc),
               u(keys[13], (output_size,), k_fc)),
    }
    return raw


def pack_params(raw, hidden_size):
    """Strip dead forget-gate columns, fuse directions gate-major, fold biases."""
    H = hidden_size

    def pack_pair(fwd, bwd):
        def w_igo(w):   # (4H, in) -> i, g, o row blocks (drop forget gate)
            return w[0:H], w[2 * H:3 * H], w[3 * H:4 * H]

        def b_igo(b):
            return b[0:H], b[2 * H:3 * H], b[3 * H:4 * H]

        wi_f, wg_f, wo_f = w_igo(fwd[0])
        wi_b, wg_b, wo_b = w_igo(bwd[0])
        w = jnp.concatenate([wi_f, wi_b, wg_f, wg_b, wo_f, wo_b], axis=0).T  # (in, 6H)

        bf = fwd[1] + fwd[2]
        bb = bwd[1] + bwd[2]
        bi_f, bg_f, bo_f = b_igo(bf)
        bi_b, bg_b, bo_b = b_igo(bb)
        b = jnp.concatenate([bi_f, bi_b, bg_f, bg_b, bo_f, bo_b]).reshape(1, 6 * H)
        return w, b

    w0, b0 = pack_pair(raw["l0f"], raw["l0b"])
    w1, b1 = pack_pair(raw["l1f"], raw["l1b"])
    w_fc, b_fc = raw["fc"]                       # output_size == 1
    wfc = w_fc.reshape(1, 2 * H)
    bfc = b_fc.reshape(1, 1)
    return (w0, b0, w1, b1, wfc, bfc)


def reference_forward(x, raw):
    """Pure-JAX reference using the RAW (unfused, full 4-gate) weights."""
    def cell(inp, p):
        w_ih, b_ih, b_hh = p
        g = inp @ w_ih.T + b_ih + b_hh
        H = g.shape[-1] // 4
        i = jax.nn.sigmoid(g[:, 0:H])
        f = jax.nn.sigmoid(g[:, H:2 * H])
        gg = jnp.tanh(g[:, 2 * H:3 * H])
        o = jax.nn.sigmoid(g[:, 3 * H:4 * H])
        c = f * jnp.zeros_like(gg) + i * gg      # c0 == 0
        return o * jnp.tanh(c)

    h1 = jnp.concatenate([cell(x, raw["l0f"]), cell(x, raw["l0b"])], axis=-1)
    h2 = jnp.concatenate([cell(h1, raw["l1f"]), cell(h1, raw["l1b"])], axis=-1)
    w_fc, b_fc = raw["fc"]
    return jax.nn.sigmoid(h2 @ w_fc.T + b_fc)


if __name__ == "__main__":
    # Small shapes consistent with the module's forward (x: (batch, input_size)).
    # hidden_size=64 -> fused gate width 6H = 384 lanes, 2H = 128-aligned slices.
    batch, input_size, hidden_size, output_size = 4, 64, 64, 1

    key = jax.random.PRNGKey(0)
    kx, kp = jax.random.split(key)
    x = jax.random.normal(kx, (batch, input_size), dtype=jnp.float32)

    raw = init_params(kp, input_size, hidden_size, output_size)
    packed = pack_params(raw, hidden_size)

    out = bilstm_forward(x, packed)
    out = jax.block_until_ready(out)

    ref = reference_forward(x, raw)
    assert out.shape == (batch, output_size)
    assert jnp.allclose(out, ref, atol=1e-5, rtol=1e-5), "mismatch vs reference"

    print("KERNEL_OK")
</pallas_src>

<mosaic_0001>
module attributes {stable_mosaic.version = 11 : i64} {
  func.func @bilstm_kernel(%arg0: i32, %arg1: memref<8x64xf32, #tpu.memory_space<vmem>>, %arg2: memref<64x384xf32, #tpu.memory_space<vmem>>, %arg3: memref<1x384xf32, #tpu.memory_space<vmem>>, %arg4: memref<128x384xf32, #tpu.memory_space<vmem>>, %arg5: memref<1x384xf32, #tpu.memory_space<vmem>>, %arg6: memref<1x128xf32, #tpu.memory_space<vmem>>, %arg7: memref<1x1xf32, #tpu.memory_space<vmem>>, %arg8: memref<8x1xf32, #tpu.memory_space<vmem>>) attributes {dimension_semantics = [#tpu.dimension_semantics<parallel>], iteration_bounds = array<i64: 1>, scalar_prefetch = 0 : i64, scratch_operands = 0 : i64, tpu.core_type = #tpu.core_type<tc>, window_params = [{transform_indices = @transform_0, window_bounds = array<i64: 8, 64>}, {pipeline_mode = #tpu.pipeline_mode<synchronous>, transform_indices = @transform_1, window_bounds = array<i64: 64, 384>}, {pipeline_mode = #tpu.pipeline_mode<synchronous>, transform_indices = @transform_2, window_bounds = array<i64: 1, 384>}, {pipeline_mode = #tpu.pipeline_mode<synchronous>, transform_indices = @transform_3, window_bounds = array<i64: 128, 384>}, {pipeline_mode = #tpu.pipeline_mode<synchronous>, transform_indices = @transform_4, window_bounds = array<i64: 1, 384>}, {pipeline_mode = #tpu.pipeline_mode<synchronous>, transform_indices = @transform_5, window_bounds = array<i64: 1, 128>}, {pipeline_mode = #tpu.pipeline_mode<synchronous>, transform_indices = @transform_6, window_bounds = array<i64: 1, 1>}, {transform_indices = @transform_7, window_bounds = array<i64: 8, 1>}]} {
    %c0 = arith.constant 0 : index
    %c0_0 = arith.constant 0 : index
    %0 = vector.load %arg1[%c0, %c0_0] : memref<8x64xf32, #tpu.memory_space<vmem>>, vector<8x64xf32>
    %c0_1 = arith.constant 0 : index
    %c0_2 = arith.constant 0 : index
    %1 = vector.load %arg2[%c0_1, %c0_2] : memref<64x384xf32, #tpu.memory_space<vmem>>, vector<64x384xf32>
    %c0_3 = arith.constant 0 : index
    %c0_4 = arith.constant 0 : index
    %2 = vector.load %arg3[%c0_3, %c0_4] : memref<1x384xf32, #tpu.memory_space<vmem>>, vector<1x384xf32>
    %cst = arith.constant dense<0.000000e+00> : vector<8x384xf32>
    %3 = tpu.matmul %0, %1, %cst {dimension_numbers = #tpu.dot_dimension_numbers<[1], [0], [0], [1], [0, 0, 1, 1], [], []>} : vector<8x64xf32>, vector<64x384xf32>, vector<8x384xf32> -> vector<8x384xf32>
    %4 = vector.broadcast %2 : vector<1x384xf32> to vector<8x384xf32>
    %5 = arith.addf %3, %4 : vector<8x384xf32>
    %6 = vector.extract_strided_slice %5 {offsets = [0, 0], sizes = [8, 128], strides = [1, 1]} : vector<8x384xf32> to vector<8x128xf32>
    %7 = arith.negf %6 : vector<8x128xf32>
    %8 = math.exp %7 : vector<8x128xf32>
    %cst_5 = arith.constant 1.000000e+00 : f32
    %9 = vector.broadcast %cst_5 : f32 to vector<8x128xf32>
    %10 = arith.addf %9, %8 : vector<8x128xf32>
    %11 = arith.divf %9, %10 : vector<8x128xf32>
    %12 = vector.extract_strided_slice %5 {offsets = [0, 128], sizes = [8, 128], strides = [1, 1]} : vector<8x384xf32> to vector<8x128xf32>
    %13 = math.tanh %12 : vector<8x128xf32>
    %14 = vector.extract_strided_slice %5 {offsets = [0, 256], sizes = [8, 128], strides = [1, 1]} : vector<8x384xf32> to vector<8x128xf32>
    %15 = arith.negf %14 : vector<8x128xf32>
    %16 = math.exp %15 : vector<8x128xf32>
    %cst_6 = arith.constant 1.000000e+00 : f32
    %17 = vector.broadcast %cst_6 : f32 to vector<8x128xf32>
    %18 = arith.addf %17, %16 : vector<8x128xf32>
    %19 = arith.divf %17, %18 : vector<8x128xf32>
    %20 = arith.mulf %11, %13 : vector<8x128xf32>
    %21 = math.tanh %20 : vector<8x128xf32>
    %22 = arith.mulf %19, %21 : vector<8x128xf32>
    %c0_7 = arith.constant 0 : index
    %c0_8 = arith.constant 0 : index
    %23 = vector.load %arg4[%c0_7, %c0_8] : memref<128x384xf32, #tpu.memory_space<vmem>>, vector<128x384xf32>
    %c0_9 = arith.constant 0 : index
    %c0_10 = arith.constant 0 : index
    %24 = vector.load %arg5[%c0_9, %c0_10] : memref<1x384xf32, #tpu.memory_space<vmem>>, vector<1x384xf32>
    %cst_11 = arith.constant dense<0.000000e+00> : vector<8x384xf32>
    %25 = tpu.matmul %22, %23, %cst_11 {dimension_numbers = #tpu.dot_dimension_numbers<[1], [0], [0], [1], [0, 0, 1, 1], [], []>} : vector<8x128xf32>, vector<128x384xf32>, vector<8x384xf32> -> vector<8x384xf32>
    %26 = vector.broadcast %24 : vector<1x384xf32> to vector<8x384xf32>
    %27 = arith.addf %25, %26 : vector<8x384xf32>
    %28 = vector.extract_strided_slice %27 {offsets = [0, 0], sizes = [8, 128], strides = [1, 1]} : vector<8x384xf32> to vector<8x128xf32>
    %29 = arith.negf %28 : vector<8x128xf32>
    %30 = math.exp %29 : vector<8x128xf32>
    %cst_12 = arith.constant 1.000000e+00 : f32
    %31 = vector.broadcast %cst_12 : f32 to vector<8x128xf32>
    %32 = arith.addf %31, %30 : vector<8x128xf32>
    %33 = arith.divf %31, %32 : vector<8x128xf32>
    %34 = vector.extract_strided_slice %27 {offsets = [0, 128], sizes = [8, 128], strides = [1, 1]} : vector<8x384xf32> to vector<8x128xf32>
    %35 = math.tanh %34 : vector<8x128xf32>
    %36 = vector.extract_strided_slice %27 {offsets = [0, 256], sizes = [8, 128], strides = [1, 1]} : vector<8x384xf32> to vector<8x128xf32>
    %37 = arith.negf %36 : vector<8x128xf32>
    %38 = math.exp %37 : vector<8x128xf32>
    %cst_13 = arith.constant 1.000000e+00 : f32
    %39 = vector.broadcast %cst_13 : f32 to vector<8x128xf32>
    %40 = arith.addf %39, %38 : vector<8x128xf32>
    %41 = arith.divf %39, %40 : vector<8x128xf32>
    %42 = arith.mulf %33, %35 : vector<8x128xf32>
    %43 = math.tanh %42 : vector<8x128xf32>
    %44 = arith.mulf %41, %43 : vector<8x128xf32>
    %c0_14 = arith.constant 0 : index
    %c0_15 = arith.constant 0 : index
    %45 = vector.load %arg6[%c0_14, %c0_15] : memref<1x128xf32, #tpu.memory_space<vmem>>, vector<1x128xf32>
    %46 = vector.broadcast %45 : vector<1x128xf32> to vector<8x128xf32>
    %47 = arith.mulf %44, %46 : vector<8x128xf32>
    %cst_16 = arith.constant dense<0.000000e+00> : vector<8xf32>
    %48 = vector.multi_reduction <add>, %47, %cst_16 [1] : vector<8x128xf32> to vector<8xf32>
    %49 = vector.shape_cast %48 : vector<8xf32> to vector<8x1xf32>
    %c0_17 = arith.constant 0 : index
    %c0_18 = arith.constant 0 : index
    %50 = vector.load %arg7[%c0_17, %c0_18] : memref<1x1xf32, #tpu.memory_space<vmem>>, vector<1x1xf32>
    %51 = vector.broadcast %50 : vector<1x1xf32> to vector<8x1xf32>
    %52 = arith.addf %49, %51 : vector<8x1xf32>
    %53 = arith.negf %52 : vector<8x1xf32>
    %54 = math.exp %53 : vector<8x1xf32>
    %cst_19 = arith.constant 1.000000e+00 : f32
    %55 = vector.broadcast %cst_19 : f32 to vector<8x1xf32>
    %56 = arith.addf %55, %54 : vector<8x1xf32>
    %57 = arith.divf %55, %56 : vector<8x1xf32>
    %c0_20 = arith.constant 0 : index
    %c0_21 = arith.constant 0 : index
    %58 = vector.load %arg8[%c0_20, %c0_21] : memref<8x1xf32, #tpu.memory_space<vmem>>, vector<8x1xf32>
    tpu.vector_store %arg8[%c0_20, %c0_21], %57 {strides = array<i32>} : memref<8x1xf32, #tpu.memory_space<vmem>>, vector<8x1xf32>,
    return
  }
  func.func @transform_0(%arg0: i32) -> (i32, i32) {
    %c0_i32 = arith.constant 0 : i32
    %c0_i32_0 = arith.constant 0 : i32
    return %arg0, %c0_i32 : i32, i32
  }
  func.func @transform_1(%arg0: i32) -> (i32, i32) {
    %c0_i32 = arith.constant 0 : i32
    %c0_i32_0 = arith.constant 0 : i32
    %c0_i32_1 = arith.constant 0 : i32
    return %c0_i32, %c0_i32_0 : i32, i32
  }
  func.func @transform_2(%arg0: i32) -> (i32, i32) {
    %c0_i32 = arith.constant 0 : i32
    %c0_i32_0 = arith.constant 0 : i32
    %c0_i32_1 = arith.constant 0 : i32
    return %c0_i32, %c0_i32_0 : i32, i32
  }
  func.func @transform_3(%arg0: i32) -> (i32, i32) {
    %c0_i32 = arith.constant 0 : i32
    %c0_i32_0 = arith.constant 0 : i32
    %c0_i32_1 = arith.constant 0 : i32
    return %c0_i32, %c0_i32_0 : i32, i32
  }
  func.func @transform_4(%arg0: i32) -> (i32, i32) {
    %c0_i32 = arith.constant 0 : i32
    %c0_i32_0 = arith.constant 0 : i32
    %c0_i32_1 = arith.constant 0 : i32
    return %c0_i32, %c0_i32_0 : i32, i32
  }
  func.func @transform_5(%arg0: i32) -> (i32, i32) {
    %c0_i32 = arith.constant 0 : i32
    %c0_i32_0 = arith.constant 0 : i32
    %c0_i32_1 = arith.constant 0 : i32
    return %c0_i32, %c0_i32_0 : i32, i32
  }
  func.func @transform_6(%arg0: i32) -> (i32, i32) {
    %c0_i32 = arith.constant 0 : i32
    %c0_i32_0 = arith.constant 0 : i32
    %c0_i32_1 = arith.constant 0 : i32
    return %c0_i32, %c0_i32_0 : i32, i32
  }
  func.func @transform_7(%arg0: i32) -> (i32, i32) {
    %c0_i32 = arith.constant 0 : i32
    %c0_i32_0 = arith.constant 0 : i32
    return %arg0, %c0_i32 : i32, i32
  }
}

</mosaic_0001>

<bundles_post_ra>
// kernel: bilstm_forward.1
= control target key start
LH: loop header
LB: loop body
LE: loop exit
PB: predicated region body
PF: predicated region fallthrough
CT: control target
= control target key end

     0   :  { %s872_s0 = inlined_call_operand.vmem [shape: f32[8,64], index: 0, kind: input, shape index: {}]   ;;  %s873_s1 = inlined_call_operand.hbm [shape: f32[64,384], index: 1, kind: input, shape index: {}]   ;;  %s874_s2 = inlined_call_operand.vmem [shape: f32[1,384], index: 2, kind: input, shape index: {}]   ;;  %s875_s3 = inlined_call_operand.hbm [shape: f32[128,384], index: 3, kind: input, shape index: {}]   ;;  %s876_s4 = inlined_call_operand.vmem [shape: f32[1,384], index: 4, kind: input, shape index: {}]   ;;  %s877_s5 = inlined_call_operand.vmem [shape: f32[1,128], index: 5, kind: input, shape index: {}]   ;;  %s878_s6 = inlined_call_operand.<no memory space> [shape: f32[1,1], index: 6, kind: input, shape index: {}]   ;;  %s879_s7 = inlined_call_operand.vmem [shape: f32[8,1], index: 7, kind: output, shape index: {}]  }
   0x1   :  { %v12_v0 = vstv %s878_s6 }
   0x2   :  { %13 = vst [vmem:[#allocation2] sm:$0x1] %v12_v0 }
   0x3   :  { %14 = vsyncpa [#allocation4], 0 }
   0x4   :  { %15 = vsyncpa [#allocation6], 0  ;;  %s769_s26 = smov [#allocation3]   ;;  %s721_s30 = scalar_lea.hbm %s873_s1, 3072 }
   0x5   :  { %s23_s27 = sshll.u32 %s769_s26, 4  ;;  %p722_p0 = scmp.ne.s32.totalorder %s873_s1, %s721_s30  ;;  %s24_s27 = int_to_ptr.vmem [resolvable:$true] %s23_s27 }
   0x6   :  { %p725_p1 = scmp.lt.u32.totalorder %s721_s30, %s873_s1 }
   0x8   :  { %p727_p2 = pnand %p725_p1, %p722_p0 }
   0xa   :  { %730 = shalt.err (!%p727_p2)
}
   0xb   :  { %s731_s6 = scalar_lea.vmem %s24_s27, 3072  ;;  %p736_p4 = scmp.lt.s32.totalorder %s24_s27, %s24_s27 }
   0xc   :  { %p732_p3 = scmp.ne.s32.totalorder %s24_s27, %s731_s6  ;;  %p737_p5 = scmp.lt.s32.totalorder %s731_s6, %s731_s6 }
   0xe   :  { %p738_p6 = por %p737_p5, %p736_p4 }
  0x10   :  { %p739_p7 = pnand %p738_p6, %p732_p3 }
  0x12   :  { %742 = shalt.err (!%p739_p7)
}
  0x13   :  { %s770_s12 = smov 384   ;;  %s771_s13 = smov 24  }
  0x14   :  { %29 = dma.hbm_to_vmem [thread:$0]  %s873_s1, 3072, %s24_s27, [#allocation4], %s770_s12, %s770_s12, %s771_s13  }
  0x15   :  { %s772_s16 = smov [#allocation5]   ;;  %s743_s20 = scalar_lea.hbm %s875_s3, 6144 }
  0x16   :  { %s37_s17 = sshll.u32 %s772_s16, 4  ;;  %p744_p8 = scmp.ne.s32.totalorder %s875_s3, %s743_s20  ;;  %s38_s17 = int_to_ptr.vmem [resolvable:$true] %s37_s17 }
  0x17   :  { %p747_p9 = scmp.lt.u32.totalorder %s743_s20, %s875_s3 }
  0x19   :  { %p749_p10 = pnand %p747_p9, %p744_p8 }
  0x1b   :  { %752 = shalt.err (!%p749_p10)
}
  0x1c   :  { %s753_s25 = scalar_lea.vmem %s38_s17, 6144  ;;  %p758_p12 = scmp.lt.s32.totalorder %s38_s17, %s38_s17 }
  0x1d   :  { %p754_p11 = scmp.ne.s32.totalorder %s38_s17, %s753_s25  ;;  %p759_p13 = scmp.lt.s32.totalorder %s753_s25, %s753_s25 }
  0x1f   :  { %p760_p0 = por %p759_p13, %p758_p12 }
  0x21   :  { %p761_p1 = pnand %p760_p0, %p754_p11 }
  0x23   :  { %764 = shalt.err (!%p761_p1)
}
  0x24   :  { %43 = dma.hbm_to_vmem [thread:$0]  %s875_s3, 6144, %s38_s17, [#allocation6], %s770_s12, %s770_s12, %s771_s13  }
  0x25   :  { %765 = dma.done.wait [#allocation4], 3072  }
  0x26   :  { %766 = vsyncadd [#allocation4], 4294964224 }
  0x27   :  { %767 = dma.done.wait [#allocation6], 6144  }
  0x28   :  { %768 = vsyncadd [#allocation6], 4294961152  ;;  %v773_v1 = vmov 0.0|0.0   ;;  %v774_v2 = vmov 0.0   ;;  %vm775_vm0 = vmmov 0   ;;  %v58_v3 = vld [vmem:[#allocation3 + $0x8] sm:$0xff] }
  0x29   :  { %618 = vmatprep.subr.bf16.mxu1 %v773_v1  ;;  %166 = vmatprep.mubr.f32.mxu0 %v774_v2  ;;  %v61_v4 = vld [vmem:[#allocation3 + $0x20] sm:$0xff]  ;;  %v60_v7 = vld [vmem:[#allocation3 + $0x18] sm:$0xff]  ;;  %v67_v9 = vld [vmem:[#allocation3 + $0x50] sm:$0xff]  ;;  %vm98_vm1 = vcmask 523264   ;;  %vm505_vm2 = vcmask 7168  }
  0x2a   :  { %564 = vmatprep.mubr.msk.f32.mxu1 %vm775_vm0, %v774_v2  ;;  %v57_v5 = vld [vmem:[#allocation3] sm:$0xff]  ;;  %v602_v6 = vpack.c.bf16 %v61_v4, %v58_v3  ;;  %v64_v8 = vld [vmem:[#allocation3 + $0x38] sm:$0xff]  ;;  %v63_v12 = vld [vmem:[#allocation3 + $0x30] sm:$0xff] }
  0x2b   :  { %v604_v10 = vpack.c.bf16 %v60_v7, %v57_v5  ;;  %v606_v11 = vpack.c.bf16 %v67_v9, %v64_v8  ;;  %v66_v13 = vld [vmem:[#allocation3 + $0x48] sm:$0xff]  ;;  %v73_v15 = vld [vmem:[#allocation3 + $0x80] sm:$0xff]  ;;  %v72_v18 = vld [vmem:[#allocation3 + $0x78] sm:$0xff] }
  0x2c   :  { %v70_v14 = vld [vmem:[#allocation3 + $0x68] sm:$0xff]  ;;  %603 = vmatprep.subr.bf16.mxu0 %v602_v6  ;;  %v608_v16 = vpack.c.bf16 %v66_v13, %v63_v12  ;;  %v69_v17 = vld [vmem:[#allocation3 + $0x60] sm:$0xff]  ;;  %v76_v20 = vld [vmem:[#allocation3 + $0x98] sm:$0xff] }
  0x2d   :  { %605 = vmatpush1.bf16.msra.mxu0 %v604_v10  ;;  %v610_v19 = vpack.c.bf16 %v73_v15, %v70_v14  ;;  %v59_v21 = vld [vmem:[#allocation3 + $0x10] sm:$0xff]  ;;  %v62_v22 = vld [vmem:[#allocation3 + $0x28] sm:$0xff]  ;;  %v65_v25 = vld [vmem:[#allocation3 + $0x40] sm:$0xff]  ;;  %v612_v27 = vpack.c.bf16 %v72_v18, %v69_v17 }
  0x2e   :  { %607 = vmatprep.subr.bf16.mxu0 %v606_v11  ;;  %v79_v23 = vld [vmem:[#allocation3 + $0xb0] sm:$0xff]  ;;  %v619_v24 = vpack.c.bf16 %v62_v22, %v59_v21  ;;  %v68_v26 = vld [vmem:[#allocation3 + $0x58] sm:$0xff]  ;;  %v78_v31 = vld [vmem:[#allocation3 + $0xa8] sm:$0xff] }
  0x2f   :  { %v75_v28 = vld [vmem:[#allocation3 + $0x90] sm:$0xff]  ;;  %v622_v29 = vpack.c.bf16 %v68_v26, %v65_v25  ;;  %v614_v30 = vpack.c.bf16 %v79_v23, %v76_v20  ;;  %v74_v33 = vld [vmem:[#allocation3 + $0x88] sm:$0xff]  ;;  %v77_v36 = vld [vmem:[#allocation3 + $0xa0] sm:$0xff] }
  0x30   :  { %620 = vmatpush3.bf16.msra.mxu1 %v619_v24  ;;  %v71_v32 = vld [vmem:[#allocation3 + $0x70] sm:$0xff]  ;;  %v616_v34 = vpack.c.bf16 %v78_v31, %v75_v28  ;;  %v80_v37 = vld [vmem:[#allocation3 + $0xb8] sm:$0xff]  ;;  %v260_v40 = vld [vmem:[#allocation5 + $0x8] sm:$0xff] }
  0x31   :  { %609 = vmatpush1.bf16.msra.mxu0 %v608_v16  ;;  %621 = vmatprep.subr.bf16.mxu1 %v773_v1  ;;  %v625_v35 = vpack.c.bf16 %v74_v33, %v71_v32  ;;  %v56_v38 = vld [vmem:[%s872_s0] sm:$0xff]  ;;  %v628_v39 = vpack.c.bf16 %v80_v37, %v77_v36  ;;  %v261_v45 = vld [vmem:[#allocation5 + $0x10] sm:$0xff]  ;;  %v264_v47 = vld [vmem:[#allocation5 + $0x28] sm:$0xff] }
  0x32   :  { %611 = vmatprep.subr.bf16.mxu0 %v610_v19  ;;  %v263_v41 = vld [vmem:[#allocation5 + $0x20] sm:$0xff]  ;;  %v262_v44 = vld [vmem:[#allocation5 + $0x18] sm:$0xff]  ;;  %v663_v48 = vpack.c.bf16 %v264_v47, %v261_v45  ;;  %v269_v50 = vld [vmem:[#allocation5 + $0x50] sm:$0xff] }
  0x33   :  { %v630_v42 = vpack.c.bf16 %v263_v41, %v260_v40  ;;  %v259_v43 = vld [vmem:[#allocation5] sm:$0xff]  ;;  %v266_v49 = vld [vmem:[#allocation5 + $0x38] sm:$0xff]  ;;  %v265_v52 = vld [vmem:[#allocation5 + $0x30] sm:$0xff] }
  0x34   :  { %623 = vmatpush3.bf16.msra.mxu1 %v622_v29  ;;  %v632_v46 = vpack.c.bf16 %v262_v44, %v259_v43  ;;  %v634_v51 = vpack.c.bf16 %v269_v50, %v266_v49  ;;  %v268_v53 = vld [vmem:[#allocation5 + $0x48] sm:$0xff]  ;;  %v267_v54 = vld [vmem:[#allocation5 + $0x40] sm:$0xff]  ;;  %v270_v56 = vld [vmem:[#allocation5 + $0x58] sm:$0xff]  ;;  %v83_v49 = vlaneseq }
  0x35   :  { %613 = vmatpush1.bf16.msra.mxu0 %v612_v27  ;;  %624 = vmatprep.subr.bf16.mxu1 %v773_v1  ;;  %v636_v55 = vpack.c.bf16 %v268_v53, %v265_v52  ;;  %v666_v57 = vpack.c.bf16 %v270_v56, %v267_v54  ;;  %v272_v58 = vld [vmem:[#allocation5 + $0x68] sm:$0xff]  ;;  %v275_v59 = vld [vmem:[#allocation5 + $0x80] sm:$0xff]  ;;  %v274_v62 = vld [vmem:[#allocation5 + $0x78] sm:$0xff] }
  0x36   :  { %615 = vmatprep.subr.bf16.mxu0 %v614_v30  ;;  %v638_v60 = vpack.c.bf16 %v275_v59, %v272_v58  ;;  %v271_v61 = vld [vmem:[#allocation5 + $0x60] sm:$0xff]  ;;  %v273_v63 = vld [vmem:[#allocation5 + $0x70] sm:$0xff]  ;;  %v278_v4 = vld [vmem:[#allocation5 + $0x98] sm:$0xff]  ;;  %v84_v50 = vshrl.u32 %v83_v49, 7 }
  0x37   :  { %v640_v0 = vpack.c.bf16 %v274_v62, %v271_v61  ;;  %v281_v5 = vld [vmem:[#allocation5 + $0xb0] sm:$0xff]  ;;  %v280_v8 = vld [vmem:[#allocation5 + $0xa8] sm:$0xff]  ;;  %v279_v9 = vld [vmem:[#allocation5 + $0xa0] sm:$0xff] }
  0x38   :  { %626 = vmatpush3.bf16.msra.mxu1 %v625_v35  ;;  %v642_v6 = vpack.c.bf16 %v281_v5, %v278_v4  ;;  %v277_v7 = vld [vmem:[#allocation5 + $0x90] sm:$0xff]  ;;  %v282_v11 = vld [vmem:[#allocation5 + $0xb8] sm:$0xff]  ;;  %v284_v13 = vld [vmem:[#allocation5 + $0xc8] sm:$0xff]  ;;  %v93_v54 = vsub.s32 2, %v84_v50  ;;  %v89_v61 = vsub.s32 1, %v84_v50 }
  0x39   :  { %617 = vmatpush1.bf16.msra.mxu0 %v616_v34  ;;  %627 = vmatprep.subr.bf16.mxu1 %v773_v1  ;;  %v644_v10 = vpack.c.bf16 %v280_v8, %v277_v7  ;;  %v672_v12 = vpack.c.bf16 %v282_v11, %v279_v9  ;;  %v287_v14 = vld [vmem:[#allocation5 + $0xe0] sm:$0xff]  ;;  %v286_v17 = vld [vmem:[#allocation5 + $0xd8] sm:$0xff]  ;;  %v285_v18 = vld [vmem:[#allocation5 + $0xd0] sm:$0xff] }
  0x3a   :  { %631 = vmatprep.subr.bf16.mxu0 %v630_v42  ;;  %v646_v15 = vpack.c.bf16 %v287_v14, %v284_v13  ;;  %v283_v16 = vld [vmem:[#allocation5 + $0xc0] sm:$0xff]  ;;  %v288_v20 = vld [vmem:[#allocation5 + $0xe8] sm:$0xff]  ;;  %v290_v22 = vld [vmem:[#allocation5 + $0xf8] sm:$0xff] }
  0x3b   :  { %v648_v19 = vpack.c.bf16 %v286_v17, %v283_v16  ;;  %v675_v21 = vpack.c.bf16 %v288_v20, %v285_v18  ;;  %v293_v23 = vld [vmem:[#allocation5 + $0x110] sm:$0xff]  ;;  %v292_v26 = vld [vmem:[#allocation5 + $0x108] sm:$0xff]  ;;  %v291_v27 = vld [vmem:[#allocation5 + $0x100] sm:$0xff] }
  0x3c   :  { %513 = vmatmul.mubr.msk.f32.vlgmr.msra.gmra.mrb[0].mxu0 %vm98_vm1, %v56_v38  ;;  %629 = vmatpush3.bf16.msra.mxu1 %v628_v39  ;;  %v650_v24 = vpack.c.bf16 %v293_v23, %v290_v22  ;;  %v289_v25 = vld [vmem:[#allocation5 + $0xf0] sm:$0xff]  ;;  %v294_v29 = vld [vmem:[#allocation5 + $0x118] sm:$0xff]  ;;  %v296_v30 = vld [vmem:[#allocation5 + $0x128] sm:$0xff] }
  0x3d   :  { %388 = vmatprep.mubr.f32.mxu0 %v774_v2  ;;  %662 = vmatprep.subr.bf16.mxu1 %v773_v1  ;;  %v652_v28 = vpack.c.bf16 %v292_v26, %v289_v25  ;;  %v299_v31 = vld [vmem:[#allocation5 + $0x140] sm:$0xff]  ;;  %v678_v32 = vpack.c.bf16 %v294_v29, %v291_v27  ;;  %v298_v35 = vld [vmem:[#allocation5 + $0x138] sm:$0xff]  ;;  %v297_v36 = vld [vmem:[#allocation5 + $0x130] sm:$0xff] }
  0x3e   :  { %633 = vmatpush1.bf16.msra.mxu0 %v632_v46  ;;  %v654_v33 = vpack.c.bf16 %v299_v31, %v296_v30  ;;  %v295_v34 = vld [vmem:[#allocation5 + $0x120] sm:$0xff]  ;;  %v302_v39 = vld [vmem:[#allocation5 + $0x158] sm:$0xff]  ;;  %v305_v40 = vld [vmem:[#allocation5 + $0x170] sm:$0xff] }
  0x3f   :  { %565 = vmatmul.mubr.msk.f32.vlgmr.msra.gmra.mrb[0].mxu1 %vm98_vm1, %v56_v38  ;;  %635 = vmatprep.subr.bf16.mxu0 %v634_v51  ;;  %v656_v37 = vpack.c.bf16 %v298_v35, %v295_v34  ;;  %v300_v38 = vld [vmem:[#allocation5 + $0x148] sm:$0xff]  ;;  %v658_v42 = vpack.c.bf16 %v305_v40, %v302_v39  ;;  %v301_v43 = vld [vmem:[#allocation5 + $0x150] sm:$0xff]  ;;  %v303_v45 = vld [vmem:[#allocation5 + $0x160] sm:$0xff]  ;;  %v85_v51 = vsub.s32 0, %v84_v50 }
  0x40   :  { %599 = vmatprep.mubr.msk.f32.mxu1 %vm775_vm0, %v774_v2  ;;  %664 = vmatpush3.bf16.msra.mxu1 %v663_v48  ;;  %v276_v2 = vld [vmem:[#allocation5 + $0x88] sm:$0xff]  ;;  %v681_v41 = vpack.c.bf16 %v300_v38, %v297_v36  ;;  %v306_v46 = vld [vmem:[#allocation5 + $0x178] sm:$0xff] }
  0x41   :  { %665 = vmatprep.subr.bf16.mxu1 %v773_v1  ;;  %v669_v3 = vpack.c.bf16 %v276_v2, %v273_v63  ;;  %v304_v44 = vld [vmem:[#allocation5 + $0x168] sm:$0xff]  ;;  %v684_v48 = vpack.c.bf16 %v306_v46, %v303_v45  ;;  %v81_v52 = vld [vmem:[%s874_s2] sm:$0x7] }
  0x42   :  { %637 = vmatpush1.bf16.msra.mxu0 %v636_v55  ;;  %v660_v47 = vpack.c.bf16 %v304_v44, %v301_v43  ;;  %v86_v53 = vrot.slane %v81_v52, %v85_v51  ;;  %v94_v58 = vrot.slane %v81_v52, %v93_v54  ;;  %v307_v13 = vld [vmem:[%s876_s4] sm:$0x7] }
  0x43   :  { %639 = vmatprep.subr.bf16.mxu0 %v638_v60  ;;  %v312_v14 = vrot.slane %v307_v13, %v85_v51  ;;  %v320_v18 = vrot.slane %v307_v13, %v93_v54  ;;  %v519_v35 = vld [vmem:[%s877_s5] ss:$0 sm:$0xff] }
  0x44   :  { %667 = vmatpush3.bf16.msra.mxu1 %v666_v57  ;;  %v520_v38 = vld [vmem:[#allocation2] ss:$0 sm:$0xff] }
  0x45   :  { %668 = vmatprep.subr.bf16.mxu1 %v773_v1 }
  0x46   :  { %641 = vmatpush1.bf16.msra.mxu0 %v640_v0  ;;  %v90_v0 = vrot.slane %v81_v52, %v89_v61 }
  0x47   :  { %643 = vmatprep.subr.bf16.mxu0 %v642_v6 }
  0x48   :  { %670 = vmatpush3.bf16.msra.mxu1 %v669_v3 }
  0x49   :  { %671 = vmatprep.subr.bf16.mxu1 %v773_v1 }
  0x4a   :  { %645 = vmatpush1.bf16.msra.mxu0 %v644_v10 }
  0x4b   :  { %647 = vmatprep.subr.bf16.mxu0 %v646_v15 }
  0x4c   :  { %673 = vmatpush3.bf16.msra.mxu1 %v672_v12 }
  0x4d   :  { %674 = vmatprep.subr.bf16.mxu1 %v773_v1 }
  0x4e   :  { %649 = vmatpush1.bf16.msra.mxu0 %v648_v19 }
  0x4f   :  { %651 = vmatprep.subr.bf16.mxu0 %v650_v24  ;;  %v316_v24 = vrot.slane %v307_v13, %v89_v61 }
  0x50   :  { %676 = vmatpush3.bf16.msra.mxu1 %v675_v21 }
  0x51   :  { %677 = vmatprep.subr.bf16.mxu1 %v773_v1 }
  0x52   :  { %653 = vmatpush1.bf16.msra.mxu0 %v652_v28 }
  0x53   :  { %655 = vmatprep.subr.bf16.mxu0 %v654_v33 }
  0x54   :  { %679 = vmatpush3.bf16.msra.mxu1 %v678_v32 }
  0x55   :  { %680 = vmatprep.subr.bf16.mxu1 %v773_v1 }
  0x56   :  { %657 = vmatpush1.bf16.msra.mxu0 %v656_v37 }
  0x57   :  { %659 = vmatprep.subr.bf16.mxu0 %v658_v42 }
  0x58   :  { %682 = vmatpush3.bf16.msra.mxu1 %v681_v41 }
  0x59   :  { %683 = vmatprep.subr.bf16.mxu1 %v773_v1 }
  0x5a   :  { %661 = vmatpush1.bf16.msra.mxu0 %v660_v47 }
  0x5c   :  { %685 = vmatpush3.bf16.msra.mxu1 %v684_v48 }
 0x10f   :  { %v168_v55 = vpop.f32.mrb[0].mxu0 }
 0x110   :  { %v169_v56 = vadd.f32 %v168_v55, %v86_v53  ;;  %v170_v57 = vpop.f32.mrb[1].mxu0 }
 0x111   :  { %v171_v2 = vadd.f32 %v170_v57, %v90_v0 }
 0x112   :  { %v515_v59 = vmul.f32 -1.442695, %v169_v56  ;;  %v239_v60 = vpop.f32.mrb[0].mxu1 }
 0x113   :  { %v240_v1 = vadd.f32 %v239_v60, %v94_v58  ;;  %v566_v62 = vpop.f32.mrb[1].mxu1 }
 0x114   :  { %693 = vpow2.f32 %v515_v59 }
 0x115   :  { %v516_v63 = vmul.f32 -1.442695, %v240_v1 }
 0x117   :  { %695 = vpow2.f32 %v516_v63 }
 0x118   :  { %697 = vtanh.f32 %v171_v2 }
 0x11e   :  { %v694_v3 = vpop.eup %693 }
 0x11f   :  { %v246_v4 = vadd.f32 1.0, %v694_v3 }
 0x121   :  { %699 = vrcp.f32 %v246_v4  ;;  %v696_v5 = vpop.eup %695 }
 0x122   :  { %v253_v6 = vadd.f32 1.0, %v696_v5  ;;  %v698_v7 = vpop.eup %697 }
 0x124   :  { %701 = vrcp.f32 %v253_v6 }
 0x12b   :  { %v700_v8 = vpop.eup %699 }
 0x12c   :  { %v256_v9 = vmul.f32 %v700_v8, %v698_v7 }
 0x12e   :  { %703 = vtanh.f32 %v256_v9  ;;  %v702_v10 = vpop.eup %701 }
 0x138   :  { %v704_v11 = vpop.eup %703 }
 0x139   :  { %v258_v12 = vmul.f32 %v704_v11, %v702_v10 }
 0x13b   :  { %389 = vmatmul.mubr.f32.vlgmr.msra.gmra.mrb[2].mxu0 %v258_v12  ;;  %600 = vmatmul.mubr.f32.vlgmr.msra.gmra.mrb[2].mxu1 %v258_v12 }
 0x20e   :  { %v390_v15 = vpop.f32.mrb[2].mxu0  ;;  %v461_v16 = vpop.f32.mrb[2].mxu1 }
 0x20f   :  { %v391_v17 = vadd.f32 %v390_v15, %v312_v14  ;;  %v392_v19 = vpop.f32.mrb[3].mxu0  ;;  %v601_v20 = vpop.f32.mrb[3].mxu1  ;;  %v462_v22 = vadd.f32 %v461_v16, %v320_v18 }
 0x210   :  { %v393_v25 = vadd.f32 %v392_v19, %v316_v24 }
 0x211   :  { %v517_v21 = vmul.f32 -1.442695, %v391_v17  ;;  %v518_v23 = vmul.f32 -1.442695, %v462_v22 }
 0x213   :  { %705 = vpow2.f32 %v517_v21 }
 0x214   :  { %707 = vpow2.f32 %v518_v23 }
 0x215   :  { %709 = vtanh.f32 %v393_v25 }
 0x21d   :  { %v706_v26 = vpop.eup %705 }
 0x21e   :  { %v468_v27 = vadd.f32 1.0, %v706_v26  ;;  %v708_v28 = vpop.eup %707 }
 0x21f   :  { %v475_v29 = vadd.f32 1.0, %v708_v28  ;;  %v710_v30 = vpop.eup %709 }
 0x220   :  { %711 = vrcp.f32 %v468_v27 }
 0x221   :  { %713 = vrcp.f32 %v475_v29 }
 0x22a   :  { %v712_v31 = vpop.eup %711 }
 0x22b   :  { %v478_v32 = vmul.f32 %v712_v31, %v710_v30  ;;  %v714_v33 = vpop.eup %713 }
 0x22d   :  { %715 = vtanh.f32 %v478_v32 }
 0x237   :  { %v716_v34 = vpop.eup %715 }
 0x238   :  { %v480_v36 = vmul.f32 %v716_v34, %v714_v33 }
 0x23a   :  { %v488_v37 = vmul.f32 %v519_v35, %v480_v36 }
 0x23c   :  { %489 = vadd.xlane.f32.xlu0 %v488_v37 }
 0x2c9   :  { %v490_v39 = vpop.xlane.xlu0 %489 }
 0x2ca   :  { %v498_v40 = vadd.f32 %v520_v38, %v490_v39 }
 0x2cc   :  { %v521_v41 = vmul.f32 -1.442695, %v498_v40 }
 0x2ce   :  { %717 = vpow2.f32 %v521_v41 }
 0x2d8   :  { %v718_v42 = vpop.eup %717 }
 0x2d9   :  { %v502_v43 = vadd.f32 1.0, %v718_v42 }
 0x2db   :  { %719 = vrcp.f32 %v502_v43 }
 0x2e5   :  { %v720_v44 = vpop.eup %719 }
 0x2e6   :  { %506 = vst.msk [vmem:[%s879_s7] sm:$0xff] %vm505_vm2, %v720_v44 }
 0x2e7   :  { %511 = vsyncpa [#allocation4], 1 }
 0x2e8   :  { %512 = vsyncpa [#allocation6], 1 }

</bundles_post_ra>
